<compile_context>
chip_gen: v6e
topology: v6e:2x2x1
jax: 0.10.0
libtpu: 0.0.40
codegen_flags: <defaults>
</compile_context>

<pallas_src>
import functools

import jax
import jax.numpy as jnp
from jax.experimental import pallas as pl
from jax.experimental.pallas import tpu as pltpu

_TM_MAX = 512  # M-tile (lane dim). 2x double-buffered cols tile (Kd<=800, f32)
               # is <= ~3.3 MB -> safely under every generation's scoped-VMEM
               # default, so we do not set vmem_limit_bytes explicitly.


def _conv12_kernel(cols_ref, w1_ref, b1_ref, w2_ref, b2_ref, o_ref):
    """Fused conv1-as-matmul + bias + ReLU, then conv2 (1x1) + bias + ReLU."""
    cols = cols_ref[0]                                      # (Kd, TM)
    h = jnp.dot(w1_ref[...], cols, preferred_element_type=jnp.float32)
    h = jnp.maximum(h + b1_ref[...], 0.0)                   # (64, TM) f32
    h = h.astype(w2_ref.dtype)                              # no-op in f32 mode
    y = jnp.dot(w2_ref[...], h, preferred_element_type=jnp.float32)
    y = jnp.maximum(y + b2_ref[...], 0.0)                   # (32, TM)
    o_ref[0] = y.astype(o_ref.dtype)


def _conv_kernel(cols_ref, w_ref, b_ref, o_ref):
    """Single conv-as-matmul + bias (no ReLU) -- conv3."""
    y = jnp.dot(w_ref[...], cols_ref[0], preferred_element_type=jnp.float32)
    o_ref[0] = (y + b_ref[...]).astype(o_ref.dtype)


def _im2col_nchw(xp, k, ho, wo):
    """xp: (N, C, Hp, Wp) edge-padded -> cols (N, C*k*k, ho*wo).

    kdim ordering is (ci, kh, kw), matching torch weight.reshape(Cout, -1).
    Built with slices + stack only (no transposes).
    """
    n, c, _, _ = xp.shape
    patches = [xp[:, :, kh:kh + ho, kw:kw + wo]
               for kh in range(k) for kw in range(k)]
    cols = jnp.stack(patches, axis=2)                       # (N, C, k*k, ho, wo)
    return cols.reshape(n, c * k * k, ho * wo)


def _m_tiles(m):
    tm = m if m <= _TM_MAX else _TM_MAX
    return tm, pl.cdiv(m, tm)


def fused_conv1_conv2(x_nchw, w1, b1, w2, b2, *, pad=2, use_bf16=False):
    """relu(conv2_1x1(relu(conv1(x)))) on the *unpadded* conv1 output grid."""
    n, cin, h, w = x_nchw.shape
    c1, _, k1, _ = w1.shape
    c2 = w2.shape[0]
    ho, wo = h + 2 * pad - k1 + 1, w + 2 * pad - k1 + 1
    xp = jnp.pad(x_nchw, ((0, 0), (0, 0), (pad, pad), (pad, pad)), mode="edge")
    cols = _im2col_nchw(xp, k1, ho, wo)                     # (N, Kd, M)
    kd, m = cin * k1 * k1, ho * wo

    cdt = jnp.bfloat16 if use_bf16 else x_nchw.dtype
    cols = cols.astype(cdt)
    w1f = w1.reshape(c1, kd).astype(cdt)
    w2f = w2.reshape(c2, c1).astype(cdt)
    b1c = b1.reshape(c1, 1).astype(jnp.float32)
    b2c = b2.reshape(c2, 1).astype(jnp.float32)

    tm, mt = _m_tiles(m)
    cols_kwargs = {}
    if n * mt >= 4:
        # conv1 has low arithmetic intensity (Cin=3) -> deepen the pipeline.
        cols_kwargs["pipeline_mode"] = pl.Buffered(3)

    out = pl.pallas_call(
        _conv12_kernel,
        out_shape=jax.ShapeDtypeStruct((n, c2, m), x_nchw.dtype),
        grid=(n, mt),
        in_specs=[
            pl.BlockSpec((1, kd, tm), lambda i, j: (i, 0, j), **cols_kwargs),
            pl.BlockSpec((c1, kd), lambda i, j: (0, 0)),    # weights stay resident
            pl.BlockSpec((c1, 1), lambda i, j: (0, 0)),
            pl.BlockSpec((c2, c1), lambda i, j: (0, 0)),
            pl.BlockSpec((c2, 1), lambda i, j: (0, 0)),
        ],
        out_specs=pl.BlockSpec((1, c2, tm), lambda i, j: (i, 0, j)),
        compiler_params=pltpu.CompilerParams(
            dimension_semantics=("parallel", "parallel")),
    )(cols, w1f, b1c, w2f, b2c)
    return out.reshape(n, c2, ho, wo)


def conv_single(x_nchw, w, b, *, pad, use_bf16=False):
    """Conv2d with replicate padding as an M-tiled matmul (no activation)."""
    n, cin, h, wid = x_nchw.shape
    cout, _, k, _ = w.shape
    ho, wo = h + 2 * pad - k + 1, wid + 2 * pad - k + 1
    xp = jnp.pad(x_nchw, ((0, 0), (0, 0), (pad, pad), (pad, pad)), mode="edge")
    cols = _im2col_nchw(xp, k, ho, wo)                      # (N, Kd, M)
    kd, m = cin * k * k, ho * wo

    cdt = jnp.bfloat16 if use_bf16 else x_nchw.dtype
    cols = cols.astype(cdt)
    wf = w.reshape(cout, kd).astype(cdt)
    bc = b.reshape(cout, 1).astype(jnp.float32)

    tm, mt = _m_tiles(m)
    out = pl.pallas_call(
        _conv_kernel,
        out_shape=jax.ShapeDtypeStruct((n, cout, m), x_nchw.dtype),
        grid=(n, mt),
        in_specs=[
            pl.BlockSpec((1, kd, tm), lambda i, j: (i, 0, j)),
            pl.BlockSpec((cout, kd), lambda i, j: (0, 0)),
            pl.BlockSpec((cout, 1), lambda i, j: (0, 0)),
        ],
        out_specs=pl.BlockSpec((1, cout, tm), lambda i, j: (i, 0, j)),
        compiler_params=pltpu.CompilerParams(
            dimension_semantics=("parallel", "parallel")),
    )(cols, wf, bc)
    return out.reshape(n, cout, ho, wo)


def init_srcnn_params(key):
    """Deterministic synthetic init matching the torch module's parameter shapes."""
    def conv_params(key, cout, cin, k, gain):
        kw_key, kb_key = jax.random.split(key)
        fan_in = cin * k * k
        std = gain * (1.0 / fan_in) ** 0.5          # kaiming-normal style
        w = std * jax.random.normal(kw_key, (cout, cin, k, k), jnp.float32)
        bound = (1.0 / fan_in) ** 0.5
        b = jax.random.uniform(kb_key, (cout,), jnp.float32, -bound, bound)
        return w, b

    k1, k2, k3 = jax.random.split(key, 3)
    relu_gain = 2.0 ** 0.5
    w1, b1 = conv_params(k1, 64, 3, 9, relu_gain)
    w2, b2 = conv_params(k2, 32, 64, 1, relu_gain)
    w3, b3 = conv_params(k3, 3, 32, 5, 1.0)
    return (w1, b1), (w2, b2), (w3, b3)


@functools.partial(jax.jit, static_argnames=("use_bf16",))
def srcnn_forward(x_nchw, params, use_bf16=False):
    (w1, b1), (w2, b2), (w3, b3) = params
    # conv1 (9x9, replicate pad 2) + ReLU with conv2 (1x1) + ReLU fused in.
    # conv2's replicate pad is deferred: a 1x1 conv commutes with edge padding.
    y = fused_conv1_conv2(x_nchw, w1, b1, w2, b2, pad=2, use_bf16=use_bf16)
    # conv3 (5x5): deferred conv2 pad (2) + conv3's own pad (2) = edge pad 4.
    y = conv_single(y, w3, b3, pad=4, use_bf16=use_bf16)
    return y                                                # already NCHW


if __name__ == "__main__":
    key = jax.random.PRNGKey(0)
    pkey, xkey = jax.random.split(key)

    params = init_srcnn_params(pkey)
    x = jax.random.normal(xkey, (2, 3, 16, 16), jnp.float32)   # NCHW, like torch

    y = srcnn_forward(x, params)
    y = jax.block_until_ready(y)

    # conv1 shrinks H/W by 4, conv2 grows by 4, conv3 preserves -> same size.
    assert y.shape == (2, 3, 16, 16), y.shape
    assert jnp.all(jnp.isfinite(y))
    print("KERNEL_OK")
</pallas_src>

<mosaic_0001>
module attributes {stable_mosaic.version = 11 : i64} {
  func.func @_conv12_kernel(%arg0: i32, %arg1: i32, %arg2: memref<1x243x144xf32, #tpu.memory_space<vmem>>, %arg3: memref<64x243xf32, #tpu.memory_space<vmem>>, %arg4: memref<64x1xf32, #tpu.memory_space<vmem>>, %arg5: memref<32x64xf32, #tpu.memory_space<vmem>>, %arg6: memref<32x1xf32, #tpu.memory_space<vmem>>, %arg7: memref<1x32x144xf32, #tpu.memory_space<vmem>>) attributes {dimension_semantics = [#tpu.dimension_semantics<parallel>, #tpu.dimension_semantics<parallel>], iteration_bounds = array<i64: 2, 1>, scalar_prefetch = 0 : i64, scratch_operands = 0 : i64, tpu.core_type = #tpu.core_type<tc>, window_params = [{transform_indices = @transform_0, window_bounds = array<i64: 1, 243, 144>}, {pipeline_mode = #tpu.pipeline_mode<synchronous>, transform_indices = @transform_1, window_bounds = array<i64: 64, 243>}, {pipeline_mode = #tpu.pipeline_mode<synchronous>, transform_indices = @transform_2, window_bounds = array<i64: 64, 1>}, {pipeline_mode = #tpu.pipeline_mode<synchronous>, transform_indices = @transform_3, window_bounds = array<i64: 32, 64>}, {pipeline_mode = #tpu.pipeline_mode<synchronous>, transform_indices = @transform_4, window_bounds = array<i64: 32, 1>}, {transform_indices = @transform_5, window_bounds = array<i64: 1, 32, 144>}]} {
    %c0 = arith.constant 0 : index
    %c0_0 = arith.constant 0 : index
    %c0_1 = arith.constant 0 : index
    %0 = vector.load %arg2[%c0, %c0_0, %c0_1] : memref<1x243x144xf32, #tpu.memory_space<vmem>>, vector<1x243x144xf32>
    %1 = vector.shape_cast %0 : vector<1x243x144xf32> to vector<243x144xf32>
    %c0_2 = arith.constant 0 : index
    %c0_3 = arith.constant 0 : index
    %2 = vector.load %arg3[%c0_2, %c0_3] : memref<64x243xf32, #tpu.memory_space<vmem>>, vector<64x243xf32>
    %cst = arith.constant dense<0.000000e+00> : vector<64x144xf32>
    %3 = tpu.matmul %2, %1, %cst {dimension_numbers = #tpu.dot_dimension_numbers<[1], [0], [0], [1], [0, 0, 1, 1], [], []>} : vector<64x243xf32>, vector<243x144xf32>, vector<64x144xf32> -> vector<64x144xf32>
    %c0_4 = arith.constant 0 : index
    %c0_5 = arith.constant 0 : index
    %4 = vector.load %arg4[%c0_4, %c0_5] : memref<64x1xf32, #tpu.memory_space<vmem>>, vector<64x1xf32>
    %5 = vector.broadcast %4 : vector<64x1xf32> to vector<64x144xf32>
    %6 = arith.addf %3, %5 : vector<64x144xf32>
    %cst_6 = arith.constant 0.000000e+00 : f32
    %7 = vector.broadcast %cst_6 : f32 to vector<64x144xf32>
    %8 = arith.maximumf %6, %7 : vector<64x144xf32>
    %c0_7 = arith.constant 0 : index
    %c0_8 = arith.constant 0 : index
    %9 = vector.load %arg5[%c0_7, %c0_8] : memref<32x64xf32, #tpu.memory_space<vmem>>, vector<32x64xf32>
    %cst_9 = arith.constant dense<0.000000e+00> : vector<32x144xf32>
    %10 = tpu.matmul %9, %8, %cst_9 {dimension_numbers = #tpu.dot_dimension_numbers<[1], [0], [0], [1], [0, 0, 1, 1], [], []>} : vector<32x64xf32>, vector<64x144xf32>, vector<32x144xf32> -> vector<32x144xf32>
    %c0_10 = arith.constant 0 : index
    %c0_11 = arith.constant 0 : index
    %11 = vector.load %arg6[%c0_10, %c0_11] : memref<32x1xf32, #tpu.memory_space<vmem>>, vector<32x1xf32>
    %12 = vector.broadcast %11 : vector<32x1xf32> to vector<32x144xf32>
    %13 = arith.addf %10, %12 : vector<32x144xf32>
    %cst_12 = arith.constant 0.000000e+00 : f32
    %14 = vector.broadcast %cst_12 : f32 to vector<32x144xf32>
    %15 = arith.maximumf %13, %14 : vector<32x144xf32>
    %c0_13 = arith.constant 0 : index
    %c0_14 = arith.constant 0 : index
    %c0_15 = arith.constant 0 : index
    %16 = vector.load %arg7[%c0_13, %c0_14, %c0_15] : memref<1x32x144xf32, #tpu.memory_space<vmem>>, vector<1x32x144xf32>
    %17 = vector.shape_cast %16 : vector<1x32x144xf32> to vector<32x144xf32>
    %18 = vector.shape_cast %15 : vector<32x144xf32> to vector<1x32x144xf32>
    tpu.vector_store %arg7[%c0_13, %c0_14, %c0_15], %18 {strides = array<i32>} : memref<1x32x144xf32, #tpu.memory_space<vmem>>, vector<1x32x144xf32>,
    return
  }
  func.func @transform_0(%arg0: i32, %arg1: i32) -> (i32, i32, i32) {
    %c0_i32 = arith.constant 0 : i32
    %c0_i32_0 = arith.constant 0 : i32
    return %arg0, %c0_i32, %arg1 : i32, i32, i32
  }
  func.func @transform_1(%arg0: i32, %arg1: i32) -> (i32, i32) {
    %c0_i32 = arith.constant 0 : i32
    %c0_i32_0 = arith.constant 0 : i32
    %c0_i32_1 = arith.constant 0 : i32
    return %c0_i32, %c0_i32_0 : i32, i32
  }
  func.func @transform_2(%arg0: i32, %arg1: i32) -> (i32, i32) {
    %c0_i32 = arith.constant 0 : i32
    %c0_i32_0 = arith.constant 0 : i32
    %c0_i32_1 = arith.constant 0 : i32
    return %c0_i32, %c0_i32_0 : i32, i32
  }
  func.func @transform_3(%arg0: i32, %arg1: i32) -> (i32, i32) {
    %c0_i32 = arith.constant 0 : i32
    %c0_i32_0 = arith.constant 0 : i32
    %c0_i32_1 = arith.constant 0 : i32
    return %c0_i32, %c0_i32_0 : i32, i32
  }
  func.func @transform_4(%arg0: i32, %arg1: i32) -> (i32, i32) {
    %c0_i32 = arith.constant 0 : i32
    %c0_i32_0 = arith.constant 0 : i32
    %c0_i32_1 = arith.constant 0 : i32
    return %c0_i32, %c0_i32_0 : i32, i32
  }
  func.func @transform_5(%arg0: i32, %arg1: i32) -> (i32, i32, i32) {
    %c0_i32 = arith.constant 0 : i32
    %c0_i32_0 = arith.constant 0 : i32
    return %arg0, %c0_i32, %arg1 : i32, i32, i32
  }
}

module attributes {stable_mosaic.version = 11 : i64} {
  func.func @_conv_kernel(%arg0: i32, %arg1: i32, %arg2: memref<1x800x256xf32, #tpu.memory_space<vmem>>, %arg3: memref<3x800xf32, #tpu.memory_space<vmem>>, %arg4: memref<3x1xf32, #tpu.memory_space<vmem>>, %arg5: memref<1x3x256xf32, #tpu.memory_space<vmem>>) attributes {dimension_semantics = [#tpu.dimension_semantics<parallel>, #tpu.dimension_semantics<parallel>], iteration_bounds = array<i64: 2, 1>, scalar_prefetch = 0 : i64, scratch_operands = 0 : i64, tpu.core_type = #tpu.core_type<tc>, window_params = [{transform_indices = @transform_0, window_bounds = array<i64: 1, 800, 256>}, {pipeline_mode = #tpu.pipeline_mode<synchronous>, transform_indices = @transform_1, window_bounds = array<i64: 3, 800>}, {pipeline_mode = #tpu.pipeline_mode<synchronous>, transform_indices = @transform_2, window_bounds = array<i64: 3, 1>}, {transform_indices = @transform_3, window_bounds = array<i64: 1, 3, 256>}]} {
    %c0 = arith.constant 0 : index
    %c0_0 = arith.constant 0 : index
    %0 = vector.load %arg3[%c0, %c0_0] : memref<3x800xf32, #tpu.memory_space<vmem>>, vector<3x800xf32>
    %c0_1 = arith.constant 0 : index
    %c0_2 = arith.constant 0 : index
    %c0_3 = arith.constant 0 : index
    %1 = vector.load %arg2[%c0_1, %c0_2, %c0_3] : memref<1x800x256xf32, #tpu.memory_space<vmem>>, vector<1x800x256xf32>
    %2 = vector.shape_cast %1 : vector<1x800x256xf32> to vector<800x256xf32>
    %cst = arith.constant dense<0.000000e+00> : vector<3x256xf32>
    %3 = tpu.matmul %0, %2, %cst {dimension_numbers = #tpu.dot_dimension_numbers<[1], [0], [0], [1], [0, 0, 1, 1], [], []>} : vector<3x800xf32>, vector<800x256xf32>, vector<3x256xf32> -> vector<3x256xf32>
    %c0_4 = arith.constant 0 : index
    %c0_5 = arith.constant 0 : index
    %4 = vector.load %arg4[%c0_4, %c0_5] : memref<3x1xf32, #tpu.memory_space<vmem>>, vector<3x1xf32>
    %5 = vector.broadcast %4 : vector<3x1xf32> to vector<3x256xf32>
    %6 = arith.addf %3, %5 : vector<3x256xf32>
    %c0_6 = arith.constant 0 : index
    %c0_7 = arith.constant 0 : index
    %c0_8 = arith.constant 0 : index
    %7 = vector.load %arg5[%c0_6, %c0_7, %c0_8] : memref<1x3x256xf32, #tpu.memory_space<vmem>>, vector<1x3x256xf32>
    %8 = vector.shape_cast %7 : vector<1x3x256xf32> to vector<3x256xf32>
    %9 = vector.shape_cast %6 : vector<3x256xf32> to vector<1x3x256xf32>
    tpu.vector_store %arg5[%c0_6, %c0_7, %c0_8], %9 {strides = array<i32>} : memref<1x3x256xf32, #tpu.memory_space<vmem>>, vector<1x3x256xf32>,
    return
  }
  func.func @transform_0(%arg0: i32, %arg1: i32) -> (i32, i32, i32) {
    %c0_i32 = arith.constant 0 : i32
    %c0_i32_0 = arith.constant 0 : i32
    return %arg0, %c0_i32, %arg1 : i32, i32, i32
  }
  func.func @transform_1(%arg0: i32, %arg1: i32) -> (i32, i32) {
    %c0_i32 = arith.constant 0 : i32
    %c0_i32_0 = arith.constant 0 : i32
    %c0_i32_1 = arith.constant 0 : i32
    return %c0_i32, %c0_i32_0 : i32, i32
  }
  func.func @transform_2(%arg0: i32, %arg1: i32) -> (i32, i32) {
    %c0_i32 = arith.constant 0 : i32
    %c0_i32_0 = arith.constant 0 : i32
    %c0_i32_1 = arith.constant 0 : i32
    return %c0_i32, %c0_i32_0 : i32, i32
  }
  func.func @transform_3(%arg0: i32, %arg1: i32) -> (i32, i32, i32) {
    %c0_i32 = arith.constant 0 : i32
    %c0_i32_0 = arith.constant 0 : i32
    return %arg0, %c0_i32, %arg1 : i32, i32, i32
  }
}

</mosaic_0001>

<bundles_post_ra>
// kernel: srcnn_forward.2
= control target key start
LH: loop header
LB: loop body
LE: loop exit
PB: predicated region body
PF: predicated region fallthrough
CT: control target
= control target key end

     0   :  { %s895_s18 = smov 0   ;;  %s897_s19 = smov 0   ;;  %s1118_s0 = inlined_call_operand.vmem [shape: f32[2,243,144], index: 0, kind: input, shape index: {}]   ;;  %s1119_s1 = inlined_call_operand.vmem [shape: f32[64,243], index: 1, kind: input, shape index: {}]   ;;  %s1120_s2 = inlined_call_operand.vmem [shape: f32[64,1], index: 2, kind: input, shape index: {}]   ;;  %s1121_s3 = inlined_call_operand.vmem [shape: f32[32,64], index: 3, kind: input, shape index: {}]   ;;  %s1122_s4 = inlined_call_operand.vmem [shape: f32[32,1], index: 4, kind: input, shape index: {}]   ;;  %s1123_s5 = inlined_call_operand.vmem [shape: f32[2,32,144], index: 5, kind: output, shape index: {}]  }
   0x1   :  { %s899_s20 = smov 0  }
   0x2 LB: > { %s27_s21 = sadd.s32 1, %s857_s19  ;;  %p789_p0 = scmp.ge.s32.totalorder %s861_s20, 1  ;;  %s861_s20 = sphi %s899_s20, %s15_s20   ;;  %s857_s19 = sphi %s897_s19, %s1125_s19   ;;  %s853_s18 = sphi %s895_s18, %s1124_s18  }
   0x3   : > { %p29_p1 = scmp.ge.s32.totalorder %s27_s21, 2  ;;  %p208_p2 = scmp.lt.s32.totalorder %s861_s20, 3 }
   0x5   : > { %s1127_s21 = smov (%p29_p1, %s27_s21), 0  ;;  %p209_p3 = pnand %p789_p0, %p208_p2 }
   0x6   : > { %p245_p4 = scmp.lt.s32.totalorder (!%p209_p3), %s853_s18, 1 }
   0x7   : > { %212 = sbr.rel (%p209_p3) target bundleno = 534 (0x216), region = 40 }
   0xc   : > { %v327_v0 = vld [vmem:[%s1119_s1 + $0x8] sm:$0xff]  ;;  %vm390_vm0 = vcmask 941056   ;;  %s1129_s18 = smov (!%p245_p4, %s853_s18), 1  ;;  %v863_v1 = vmov 0   ;;  %v349_v3 = vld [vmem:[%s1120_s2 + $0x38] sm:$0xff]  ;;  %v346_v4 = vld [vmem:[%s1120_s2 + $0x20] sm:$0xff] }
   0xd   : > { %795 = vmatprep.mubr.msk.f32.mxu0 %vm390_vm0, %v327_v0  ;;  %838 = vset.pattern.permute.xlu1 %v863_v1  ;;  %s810_s24 = smul.u32 496, %s1129_s18  ;;  %v347_v2 = vld [vmem:[%s1120_s2 + $0x28] sm:$0xff]  ;;  %v348_v9 = vld [vmem:[%s1120_s2 + $0x30] sm:$0xff]  ;;  %v345_v30 = vld [vmem:[%s1120_s2 + $0x18] sm:$0xff]  ;;  %vm415_vm1 = vcmask 1042432   ;;  %vm579_vm2 = vcmask 523264  }
   0xe   : > { %837 = vset.pattern.permute.xlu0 %v863_v1  ;;  %377 = vperm.xlu1 %838, %v347_v2   ;;  %v344_v13 = vld [vmem:[%s1120_s2 + $0x10] sm:$0xff]  ;;  %v342_v32 = vld [vmem:[%s1120_s2] sm:$0xff]  ;;  %v343_v34 = vld [vmem:[%s1120_s2 + $0x8] sm:$0xff]  ;;  %s809_s27 = sshll.u32 %s1129_s18, 6  ;;  %vm690_vm3 = vcmask 130048  }
   0xf   : > { %s929_s6 = scalar_lea.vmem %s1118_s0, %s810_s24  ;;  %387 = vperm.xlu0 %837, %v349_v3   ;;  %v556_v36 = vld [vmem:[%s1122_s4 + $0x8] sm:$0xff]  ;;  %v555_v40 = vld [vmem:[%s1122_s4] sm:$0xff]  ;;  %v558_v42 = vld [vmem:[%s1122_s4 + $0x18] sm:$0xff]  ;;  %s1095_s30 = scalar_lea.vmem %s1123_s5, %s809_s27 }
  0x10   : > { %v295_v5 = vld [vmem:[%s929_s6 + $0xf8] sm:$0xff]  ;;  %v294_v6 = vld [vmem:[%s929_s6 + $0xf0] sm:$0xff]  ;;  %v293_v7 = vld [vmem:[%s929_s6 + $0xe8] sm:$0xff] }
  0x11   : > { %422 = vmatprep.subr.mxu0 %v295_v5  ;;  %v292_v8 = vld [vmem:[%s929_s6 + $0xe0] sm:$0xff]  ;;  %v291_v10 = vld [vmem:[%s929_s6 + $0xd8] sm:$0xff]  ;;  %v290_v11 = vld [vmem:[%s929_s6 + $0xd0] sm:$0xff] }
  0x12   : > { %423 = vmatpush1.msra.mxu0 %v294_v6  ;;  %372 = vperm.xlu1 %838, %v346_v4   ;;  %v289_v12 = vld [vmem:[%s929_s6 + $0xc8] sm:$0xff]  ;;  %v288_v14 = vld [vmem:[%s929_s6 + $0xc0] sm:$0xff]  ;;  %v287_v15 = vld [vmem:[%s929_s6 + $0xb8] sm:$0xff] }
  0x13   : > { %424 = vmatprep.subr.mxu0 %v293_v7  ;;  %382 = vperm.xlu0 %837, %v348_v9   ;;  %v286_v16 = vld [vmem:[%s929_s6 + $0xb0] sm:$0xff]  ;;  %v285_v17 = vld [vmem:[%s929_s6 + $0xa8] sm:$0xff]  ;;  %v284_v18 = vld [vmem:[%s929_s6 + $0xa0] sm:$0xff] }
  0x14   : > { %425 = vmatpush1.msra.mxu0 %v292_v8  ;;  %v283_v19 = vld [vmem:[%s929_s6 + $0x98] sm:$0xff]  ;;  %v282_v20 = vld [vmem:[%s929_s6 + $0x90] sm:$0xff]  ;;  %v281_v21 = vld [vmem:[%s929_s6 + $0x88] sm:$0xff] }
  0x15   : > { %426 = vmatprep.subr.mxu0 %v291_v10  ;;  %v280_v22 = vld [vmem:[%s929_s6 + $0x80] sm:$0xff]  ;;  %v279_v23 = vld [vmem:[%s929_s6 + $0x78] sm:$0xff]  ;;  %v278_v24 = vld [vmem:[%s929_s6 + $0x70] sm:$0xff] }
  0x16   : > { %427 = vmatpush1.msra.mxu0 %v290_v11  ;;  %362 = vperm.xlu1 %838, %v344_v13   ;;  %v277_v25 = vld [vmem:[%s929_s6 + $0x68] sm:$0xff]  ;;  %v276_v26 = vld [vmem:[%s929_s6 + $0x60] sm:$0xff]  ;;  %v275_v27 = vld [vmem:[%s929_s6 + $0x58] sm:$0xff] }
  0x17   : > { %428 = vmatprep.subr.mxu0 %v289_v12  ;;  %v274_v28 = vld [vmem:[%s929_s6 + $0x50] sm:$0xff]  ;;  %v273_v29 = vld [vmem:[%s929_s6 + $0x48] sm:$0xff]  ;;  %v272_v31 = vld [vmem:[%s929_s6 + $0x40] sm:$0xff]  ;;  %367 = vperm.xlu0 %837, %v345_v30  }
  0x18   : > { %429 = vmatpush1.msra.mxu0 %v288_v14  ;;  %v271_v33 = vld [vmem:[%s929_s6 + $0x38] sm:$0xff]  ;;  %v270_v35 = vld [vmem:[%s929_s6 + $0x30] sm:$0xff]  ;;  %v269_v37 = vld [vmem:[%s929_s6 + $0x28] sm:$0xff] }
  0x19   : > { %430 = vmatprep.subr.mxu0 %v287_v15  ;;  %v268_v38 = vld [vmem:[%s929_s6 + $0x20] sm:$0xff]  ;;  %v267_v39 = vld [vmem:[%s929_s6 + $0x18] sm:$0xff]  ;;  %v266_v41 = vld [vmem:[%s929_s6 + $0x10] sm:$0xff] }
  0x1a   : > { %431 = vmatpush1.msra.mxu0 %v286_v16  ;;  %352 = vperm.xlu1 %838, %v342_v32   ;;  %v265_v43 = vld [vmem:[%s929_s6 + $0x8] sm:$0xff]  ;;  %v264_v44 = vld [vmem:[%s929_s6] sm:$0xff]  ;;  %v557_v46 = vld [vmem:[%s1122_s4 + $0x10] sm:$0xff] }
  0x1b   : > { %432 = vmatprep.subr.mxu0 %v285_v17  ;;  %357 = vperm.xlu0 %837, %v343_v34   ;;  %v325_v45 = vld [vmem:[%s929_s6 + $0x1e8] sm:$0x7]  ;;  %v324_v47 = vld [vmem:[%s929_s6 + $0x1e0] sm:$0x7]  ;;  %v323_v48 = vld [vmem:[%s929_s6 + $0x1d8] sm:$0xff] }
  0x1c   : > { %433 = vmatpush1.msra.mxu0 %v284_v18  ;;  %v322_v49 = vld [vmem:[%s929_s6 + $0x1d0] sm:$0xff]  ;;  %v321_v50 = vld [vmem:[%s929_s6 + $0x1c8] sm:$0xff]  ;;  %v320_v51 = vld [vmem:[%s929_s6 + $0x1c0] sm:$0xff] }
  0x1d   : > { %434 = vmatprep.subr.mxu0 %v283_v19  ;;  %v319_v52 = vld [vmem:[%s929_s6 + $0x1b8] sm:$0xff]  ;;  %v318_v53 = vld [vmem:[%s929_s6 + $0x1b0] sm:$0xff]  ;;  %v317_v54 = vld [vmem:[%s929_s6 + $0x1a8] sm:$0xff] }
  0x1e   : > { %435 = vmatpush1.msra.mxu0 %v282_v20  ;;  %566 = vperm.xlu1 %838, %v556_v36   ;;  %v316_v55 = vld [vmem:[%s929_s6 + $0x1a0] sm:$0xff]  ;;  %v315_v56 = vld [vmem:[%s929_s6 + $0x198] sm:$0xff]  ;;  %v314_v57 = vld [vmem:[%s929_s6 + $0x190] sm:$0xff] }
  0x1f   : > { %436 = vmatprep.subr.mxu0 %v281_v21  ;;  %561 = vperm.xlu0 %837, %v555_v40   ;;  %v313_v58 = vld [vmem:[%s929_s6 + $0x188] sm:$0xff]  ;;  %v312_v59 = vld [vmem:[%s929_s6 + $0x180] sm:$0xff]  ;;  %v311_v60 = vld [vmem:[%s929_s6 + $0x178] sm:$0xff] }
  0x20   : > { %437 = vmatpush1.msra.mxu0 %v280_v22  ;;  %v310_v61 = vld [vmem:[%s929_s6 + $0x170] sm:$0xff]  ;;  %v309_v62 = vld [vmem:[%s929_s6 + $0x168] sm:$0xff]  ;;  %v308_v63 = vld [vmem:[%s929_s6 + $0x160] sm:$0xff] }
  0x21   : > { %438 = vmatprep.subr.mxu0 %v279_v23  ;;  %v307_v0 = vld [vmem:[%s929_s6 + $0x158] sm:$0xff]  ;;  %v306_v1 = vld [vmem:[%s929_s6 + $0x150] sm:$0xff]  ;;  %v305_v2 = vld [vmem:[%s929_s6 + $0x148] sm:$0xff] }
  0x22   : > { %439 = vmatpush1.msra.mxu0 %v278_v24  ;;  %576 = vperm.xlu1 %838, %v558_v42   ;;  %v304_v3 = vld [vmem:[%s929_s6 + $0x140] sm:$0xff]  ;;  %v303_v4 = vld [vmem:[%s929_s6 + $0x138] sm:$0xff]  ;;  %v302_v5 = vld [vmem:[%s929_s6 + $0x130] sm:$0xff] }
  0x23   : > { %440 = vmatprep.subr.mxu0 %v277_v25  ;;  %571 = vperm.xlu0 %837, %v557_v46   ;;  %v301_v6 = vld [vmem:[%s929_s6 + $0x128] sm:$0xff]  ;;  %v300_v7 = vld [vmem:[%s929_s6 + $0x120] sm:$0xff]  ;;  %v299_v8 = vld [vmem:[%s929_s6 + $0x118] sm:$0xff] }
  0x24   : > { %441 = vmatpush1.msra.mxu0 %v276_v26  ;;  %v298_v9 = vld [vmem:[%s929_s6 + $0x110] sm:$0xff]  ;;  %v297_v10 = vld [vmem:[%s929_s6 + $0x108] sm:$0xff]  ;;  %v296_v11 = vld [vmem:[%s929_s6 + $0x100] sm:$0xff] }
  0x25   : > { %442 = vmatprep.subr.mxu0 %v275_v27  ;;  %v326_v12 = vld [vmem:[%s1119_s1] sm:$0xff]  ;;  %v329_v13 = vld [vmem:[%s1119_s1 + $0x18] sm:$0xff]  ;;  %v328_v14 = vld [vmem:[%s1119_s1 + $0x10] sm:$0xff]  ;;  %v864_v27 = vmov 0.0  }
  0x26   : > { %443 = vmatpush1.msra.mxu0 %v274_v28  ;;  %v331_v15 = vld [vmem:[%s1119_s1 + $0x28] sm:$0xff]  ;;  %v330_v16 = vld [vmem:[%s1119_s1 + $0x20] sm:$0xff]  ;;  %v333_v17 = vld [vmem:[%s1119_s1 + $0x38] sm:$0xff]  ;;  %656 = vmatprep.mubr.f32.mxu1 %v864_v27 }
  0x27   : > { %444 = vmatprep.subr.mxu0 %v273_v29  ;;  %v332_v18 = vld [vmem:[%s1119_s1 + $0x30] sm:$0xff]  ;;  %v335_v19 = vld [vmem:[%s1119_s1 + $0x48] sm:$0xff]  ;;  %v334_v20 = vld [vmem:[%s1119_s1 + $0x40] sm:$0xff] }
  0x28   : > { %445 = vmatpush1.msra.mxu0 %v272_v31  ;;  %v337_v21 = vld [vmem:[%s1119_s1 + $0x58] sm:$0xff]  ;;  %v336_v22 = vld [vmem:[%s1119_s1 + $0x50] sm:$0xff]  ;;  %v339_v23 = vld [vmem:[%s1119_s1 + $0x68] sm:$0xff] }
  0x29   : > { %446 = vmatprep.subr.mxu0 %v271_v33  ;;  %v338_v24 = vld [vmem:[%s1119_s1 + $0x60] sm:$0xff]  ;;  %v341_v25 = vld [vmem:[%s1119_s1 + $0x78] sm:$0xff]  ;;  %v340_v26 = vld [vmem:[%s1119_s1 + $0x70] sm:$0xff] }
  0x2a   : > { %447 = vmatpush1.msra.mxu0 %v270_v35 }
  0x2b   : > { %448 = vmatprep.subr.mxu0 %v269_v37 }
  0x2c   : > { %449 = vmatpush1.msra.mxu0 %v268_v38 }
  0x2d   : > { %450 = vmatprep.subr.mxu0 %v267_v39 }
  0x2e   : > { %451 = vmatpush1.msra.mxu0 %v266_v41 }
  0x2f   : > { %452 = vmatprep.subr.mxu0 %v265_v43 }
  0x30   : > { %453 = vmatpush1.msra.mxu0 %v264_v44 }
  0x31   : > { %793 = vmatprep.subr.msk.mxu0 %vm415_vm1, %v325_v45 }
  0x32   : > { %794 = vmatpush2.msk.msra.mxu0 %vm415_vm1, %v324_v47 }
  0x33   : > { %458 = vmatprep.subr.mxu0 %v323_v48 }
  0x34   : > { %459 = vmatpush2.msra.mxu0 %v322_v49 }
  0x35   : > { %460 = vmatprep.subr.mxu0 %v321_v50 }
  0x36   : > { %461 = vmatpush2.msra.mxu0 %v320_v51 }
  0x37   : > { %462 = vmatprep.subr.mxu0 %v319_v52 }
  0x38   : > { %463 = vmatpush2.msra.mxu0 %v318_v53 }
  0x39   : > { %464 = vmatprep.subr.mxu0 %v317_v54 }
  0x3a   : > { %465 = vmatpush2.msra.mxu0 %v316_v55 }
  0x3b   : > { %466 = vmatprep.subr.mxu0 %v315_v56 }
  0x3c   : > { %467 = vmatpush2.msra.mxu0 %v314_v57 }
  0x3d   : > { %468 = vmatprep.subr.mxu0 %v313_v58 }
  0x3e   : > { %469 = vmatpush2.msra.mxu0 %v312_v59 }
  0x3f   : > { %470 = vmatprep.subr.mxu0 %v311_v60 }
  0x40   : > { %471 = vmatpush2.msra.mxu0 %v310_v61 }
  0x41   : > { %472 = vmatprep.subr.mxu0 %v309_v62 }
  0x42   : > { %473 = vmatpush2.msra.mxu0 %v308_v63 }
  0x43   : > { %474 = vmatprep.subr.mxu0 %v307_v0 }
  0x44   : > { %475 = vmatpush2.msra.mxu0 %v306_v1 }
  0x45   : > { %476 = vmatprep.subr.mxu0 %v305_v2 }
  0x46   : > { %477 = vmatpush2.msra.mxu0 %v304_v3 }
  0x47   : > { %478 = vmatprep.subr.mxu0 %v303_v4 }
  0x48   : > { %479 = vmatpush2.msra.mxu0 %v302_v5 }
  0x49   : > { %480 = vmatprep.subr.mxu0 %v301_v6 }
  0x4a   : > { %481 = vmatpush2.msra.mxu0 %v300_v7 }
  0x4b   : > { %482 = vmatprep.subr.mxu0 %v299_v8 }
  0x4c   : > { %483 = vmatpush2.msra.mxu0 %v298_v9 }
  0x4d   : > { %484 = vmatprep.subr.mxu0 %v297_v10 }
  0x4e   : > { %485 = vmatpush2.msra.mxu0 %v296_v11 }
  0x4f   : > { %487 = vmatmul.mubr.f32.vlgmr.msra.gmra.mxu0 %v326_v12 }
  0x50   : > { %796 = vmatprep.mubr.msk.f32.mxu0 %vm390_vm0, %v329_v13 }
  0x53   : > { %493 = vmatmul.mubr.f32.gmra.mxu0 %v328_v14 }
  0x54   : > { %797 = vmatprep.mubr.msk.f32.mxu0 %vm390_vm0, %v331_v15 }
  0x57   : > { %499 = vmatmul.mubr.f32.gmra.mxu0 %v330_v16 }
  0x58   : > { %798 = vmatprep.mubr.msk.f32.mxu0 %vm390_vm0, %v333_v17 }
  0x5b   : > { %505 = vmatmul.mubr.f32.gmra.mxu0 %v332_v18 }
  0x5c   : > { %799 = vmatprep.mubr.msk.f32.mxu0 %vm390_vm0, %v335_v19 }
  0x5f   : > { %511 = vmatmul.mubr.f32.gmra.mxu0 %v334_v20  ;;  %v551_v20 = vld [vmem:[%s1121_s3] sm:$0xff] }
  0x60   : > { %800 = vmatprep.mubr.msk.f32.mxu0 %vm390_vm0, %v337_v21  ;;  %v552_v21 = vld [vmem:[%s1121_s3 + $0x8] sm:$0xff] }
  0x63   : > { %517 = vmatmul.mubr.f32.gmra.mxu0 %v336_v22  ;;  %v553_v22 = vld [vmem:[%s1121_s3 + $0x10] sm:$0xff] }
  0x64   : > { %801 = vmatprep.mubr.msk.f32.mxu0 %vm390_vm0, %v339_v23  ;;  %v554_v23 = vld [vmem:[%s1121_s3 + $0x18] sm:$0xff] }
  0x67   : > { %523 = vmatmul.mubr.f32.gmra.mxu0 %v338_v24 }
  0x68   : > { %802 = vmatprep.mubr.msk.f32.mxu0 %vm390_vm0, %v341_v25 }
  0x6b   : > { %529 = vmatmul.mubr.f32.gmra.mxu0 %v340_v26 }
  0x89   : > { %v378_v41 = vpop.permute.xlu1 %377 }
  0x8a   : > { %v388_v39 = vpop.permute.xlu0 %387 }
  0x8d   : > { %v373_v46 = vpop.permute.xlu1 %372 }
  0x8e   : > { %v383_v44 = vpop.permute.xlu0 %382 }
  0x91   : > { %v363_v57 = vpop.permute.xlu1 %362 }
  0x92   : > { %v368_v52 = vpop.permute.xlu0 %367 }
  0x95   : > { %v353_v7 = vpop.permute.xlu1 %352 }
  0x96   : > { %v358_v2 = vpop.permute.xlu0 %357 }
  0x9a   : > { %v562_v24 = vpop.permute.xlu0 %561 }
 0x10f   : > { %v488_v28 = vpop.f32.mrf.mxu0 }
 0x110   : > { %v489_v14 = vadd.f32 %v488_v28, %v353_v7 }
 0x111   : > { %v490_v29 = vpop.f32.mrf.mxu0 }
 0x112   : > { %v491_v12 = vadd.f32 %v490_v29, %v353_v7  ;;  %v535_v19 = vmax.f32 %v489_v14, 0.0 }
 0x113   : > { %v494_v30 = vpop.f32.mrf.mxu0 }
 0x114   : > { %v495_v10 = vadd.f32 %v494_v30, %v358_v2  ;;  %v536_v18 = vmax.f32 %v491_v12, 0.0  ;;  %v567_v30 = vpop.permute.xlu1 %566 }
 0x115   : > { %v496_v31 = vpop.f32.mrf.mxu0 }
 0x116   : > { %v497_v8 = vadd.f32 %v496_v31, %v358_v2  ;;  %v537_v17 = vmax.f32 %v495_v10, 0.0 }
 0x117   : > { %v500_v32 = vpop.f32.mrf.mxu0 }
 0x118   : > { %v501_v5 = vadd.f32 %v500_v32, %v363_v57  ;;  %v538_v16 = vmax.f32 %v497_v8, 0.0 }
 0x119   : > { %v502_v33 = vpop.f32.mrf.mxu0 }
 0x11a   : > { %v503_v3 = vadd.f32 %v502_v33, %v363_v57  ;;  %v539_v15 = vmax.f32 %v501_v5, 0.0 }
 0x11b   : > { %v506_v34 = vpop.f32.mrf.mxu0 }
 0x11c   : > { %v507_v0 = vadd.f32 %v506_v34, %v368_v52  ;;  %v540_v13 = vmax.f32 %v503_v3, 0.0 }
 0x11d   : > { %v508_v35 = vpop.f32.mrf.mxu0 }
 0x11e   : > { %v509_v62 = vadd.f32 %v508_v35, %v368_v52  ;;  %v541_v11 = vmax.f32 %v507_v0, 0.0 }
 0x11f   : > { %v512_v36 = vpop.f32.mrf.mxu0 }
 0x120   : > { %v513_v60 = vadd.f32 %v512_v36, %v373_v46  ;;  %v542_v9 = vmax.f32 %v509_v62, 0.0 }
 0x121   : > { %v514_v37 = vpop.f32.mrf.mxu0 }
 0x122   : > { %v515_v58 = vadd.f32 %v514_v37, %v373_v46  ;;  %v543_v6 = vmax.f32 %v513_v60, 0.0  ;;  %v572_v37 = vpop.permute.xlu0 %571 }
 0x123   : > { %v518_v38 = vpop.f32.mrf.mxu0 }
 0x124   : > { %v519_v55 = vadd.f32 %v518_v38, %v378_v41  ;;  %v544_v4 = vmax.f32 %v515_v58, 0.0 }
 0x125   : > { %v520_v40 = vpop.f32.mrf.mxu0 }
 0x126   : > { %v521_v53 = vadd.f32 %v520_v40, %v378_v41  ;;  %v545_v1 = vmax.f32 %v519_v55, 0.0 }
 0x127   : > { %v524_v42 = vpop.f32.mrf.mxu0 }
 0x128   : > { %v525_v51 = vadd.f32 %v524_v42, %v383_v44  ;;  %v546_v63 = vmax.f32 %v521_v53, 0.0 }
 0x129   : > { %v526_v43 = vpop.f32.mrf.mxu0 }
 0x12a   : > { %v527_v49 = vadd.f32 %v526_v43, %v383_v44  ;;  %v547_v61 = vmax.f32 %v525_v51, 0.0  ;;  %v577_v44 = vpop.permute.xlu1 %576 }
 0x12b   : > { %v530_v45 = vpop.f32.mrf.mxu0 }
 0x12c   : > { %v531_v47 = vadd.f32 %v530_v45, %v388_v39  ;;  %v548_v59 = vmax.f32 %v527_v49, 0.0 }
 0x12d   : > { %v532_v48 = vpop.f32.mrf.mxu0 }
 0x12e   : > { %v533_v50 = vadd.f32 %v532_v48, %v388_v39  ;;  %v549_v56 = vmax.f32 %v531_v47, 0.0 }
 0x130   : > { %v550_v54 = vmax.f32 %v533_v50, 0.0 }
 0x132   : > { %608 = vmatprep.subr.mxu1 %v550_v54 }
 0x133   : > { %609 = vmatpush1.msra.mxu1 %v549_v56 }
 0x134   : > { %610 = vmatprep.subr.mxu1 %v548_v59 }
 0x135   : > { %611 = vmatpush1.msra.mxu1 %v547_v61 }
 0x136   : > { %612 = vmatprep.subr.mxu1 %v546_v63 }
 0x137   : > { %613 = vmatpush1.msra.mxu1 %v545_v1 }
 0x138   : > { %614 = vmatprep.subr.mxu1 %v544_v4 }
 0x139   : > { %615 = vmatpush1.msra.mxu1 %v543_v6 }
 0x13a   : > { %616 = vmatprep.subr.mxu1 %v542_v9 }
 0x13b   : > { %617 = vmatpush1.msra.mxu1 %v541_v11 }
 0x13c   : > { %618 = vmatprep.subr.mxu1 %v540_v13 }
 0x13d   : > { %619 = vmatpush1.msra.mxu1 %v539_v15 }
 0x13e   : > { %620 = vmatprep.subr.mxu1 %v538_v16 }
 0x13f   : > { %621 = vmatpush1.msra.mxu1 %v537_v17 }
 0x140   : > { %622 = vmatprep.subr.mxu1 %v536_v18 }
 0x141   : > { %623 = vmatpush1.msra.mxu1 %v535_v19 }
 0x142   : > { %803 = vmatmul.mubr.msk.f32.vlgmr.msra.gmra.mxu1 %vm579_vm2, %v551_v20 }
 0x143   : > { %662 = vmatprep.mubr.f32.mxu1 %v864_v27 }
 0x146   : > { %804 = vmatmul.mubr.msk.f32.gmra.mxu1 %vm579_vm2, %v552_v21 }
 0x147   : > { %668 = vmatprep.mubr.f32.mxu1 %v864_v27 }
 0x14a   : > { %805 = vmatmul.mubr.msk.f32.gmra.mxu1 %vm579_vm2, %v553_v22 }
 0x14b   : > { %674 = vmatprep.mubr.f32.mxu1 %v864_v27 }
 0x14e   : > { %806 = vmatmul.mubr.msk.f32.gmra.mxu1 %vm579_vm2, %v554_v23 }
 0x202   : > { %v658_v25 = vpop.f32.mrf.mxu1 }
 0x203   : > { %v659_v26 = vadd.f32 %v658_v25, %v562_v24 }
 0x204   : > { %v660_v28 = vpop.f32.mrf.mxu1 }
 0x205   : > { %v681_v29 = vmax.f32 %v659_v26, 0.0  ;;  %v661_v27 = vadd.f32 %v660_v28, %v562_v24 }
 0x206   : > { %v664_v31 = vpop.f32.mrf.mxu1 }
 0x207   : > { %689 = vst [vmem:[%s1095_s30] sm:$0xff] %v681_v29  ;;  %v682_v32 = vmax.f32 %v661_v27, 0.0  ;;  %v665_v33 = vadd.f32 %v664_v31, %v567_v30 }
 0x208   : > { %v666_v34 = vpop.f32.mrf.mxu1 }
 0x209   : > { %691 = vst.msk [vmem:[%s1095_s30 + $0x8] sm:$0xff] %vm690_vm3, %v682_v32  ;;  %v683_v35 = vmax.f32 %v665_v33, 0.0  ;;  %v667_v36 = vadd.f32 %v666_v34, %v567_v30 }
 0x20a   : > { %v670_v38 = vpop.f32.mrf.mxu1 }
 0x20b   : > { %692 = vst [vmem:[%s1095_s30 + $0x10] sm:$0xff] %v683_v35  ;;  %v684_v39 = vmax.f32 %v667_v36, 0.0  ;;  %v671_v40 = vadd.f32 %v670_v38, %v572_v37 }
 0x20c   : > { %v672_v41 = vpop.f32.mrf.mxu1 }
 0x20d   : > { %693 = vst.msk [vmem:[%s1095_s30 + $0x18] sm:$0xff] %vm690_vm3, %v684_v39  ;;  %v685_v42 = vmax.f32 %v671_v40, 0.0  ;;  %v673_v43 = vadd.f32 %v672_v41, %v572_v37 }
 0x20e   : > { %v676_v45 = vpop.f32.mrf.mxu1 }
 0x20f   : > { %694 = vst [vmem:[%s1095_s30 + $0x20] sm:$0xff] %v685_v42  ;;  %v686_v46 = vmax.f32 %v673_v43, 0.0  ;;  %v677_v47 = vadd.f32 %v676_v45, %v577_v44 }
 0x210   : > { %v678_v48 = vpop.f32.mrf.mxu1 }
 0x211   : > { %695 = vst.msk [vmem:[%s1095_s30 + $0x28] sm:$0xff] %vm690_vm3, %v686_v46  ;;  %v687_v49 = vmax.f32 %v677_v47, 0.0  ;;  %v679_v50 = vadd.f32 %v678_v48, %v577_v44 }
 0x213   : > { %696 = vst [vmem:[%s1095_s30 + $0x30] sm:$0xff] %v687_v49  ;;  %v688_v51 = vmax.f32 %v679_v50, 0.0 }
 0x215   : > { %697 = vst.msk [vmem:[%s1095_s30 + $0x38] sm:$0xff] %vm690_vm3, %v688_v51 }
 0x216 PF: > { %s15_s20 = sadd.s32 1, %s861_s20   ;;  %s1124_s18 = smov %s857_s19 }
 0x217   : > { %p12_p5 = scmp.ge.s32.totalorder %s15_s20, 4   ;;  %s1125_s19 = smov %s1127_s21 }
 0x219   :  { %14 = sbr.rel (!%p12_p5) target bundleno = 2 (0x2), region = 70 }

// kernel: srcnn_forward.3
= control target key start
LH: loop header
LB: loop body
LE: loop exit
PB: predicated region body
PF: predicated region fallthrough
CT: control target
= control target key end

     0   :  { %s898_s12 = smov 0   ;;  %s900_s13 = smov 0   ;;  %s1167_s0 = inlined_call_operand.vmem [shape: f32[2,800,256], index: 0, kind: input, shape index: {}]   ;;  %s1168_s1 = inlined_call_operand.vmem [shape: f32[3,800], index: 1, kind: input, shape index: {}]   ;;  %s1169_s2 = inlined_call_operand.vmem [shape: f32[3,1], index: 2, kind: input, shape index: {}]   ;;  %s1170_s3 = inlined_call_operand.vmem [shape: f32[2,3,256], index: 3, kind: output, shape index: {}]  }
   0x1   :  { %s902_s14 = smov 0  }
   0x2 LB: > { %s25_s15 = sadd.s32 1, %s870_s13  ;;  %p813_p0 = scmp.ge.s32.totalorder %s874_s14, 1  ;;  %s874_s14 = sphi %s902_s14, %s13_s14   ;;  %s870_s13 = sphi %s900_s13, %s1172_s13   ;;  %s866_s12 = sphi %s898_s12, %s1171_s12  }
   0x3   : > { %p27_p1 = scmp.ge.s32.totalorder %s25_s15, 2  ;;  %p158_p2 = scmp.lt.s32.totalorder %s874_s14, 3 }
   0x5   : > { %s1174_s15 = smov (%p27_p1, %s25_s15), 0  ;;  %p159_p3 = pnand %p813_p0, %p158_p2 }
   0x6   : > { %p191_p4 = scmp.lt.s32.totalorder (!%p159_p3), %s866_s12, 1 }
   0x7   : > { %162 = sbr.rel (%p159_p3) target bundleno = 347 (0x15b), region = 32 }
   0xc   : > { %v919_v0 = vld [vmem:[%s1168_s1] sm:$0x77]  ;;  %v924_v1 = vld [vmem:[%s1168_s1 + $0x8] sm:$0x77]  ;;  %s1176_s12 = smov (!%p191_p4, %s866_s12), 1  ;;  %vm430_vm0 = vcmask 261120  }
   0xd   : > { %v424_v2 = vcombine.high %v919_v0, %v919_v0  ;;  %v425_v3 = vcombine.high %v924_v1, %v924_v1  ;;  %s821_s20 = smul.u32 1600, %s1176_s12  ;;  %s820_s30 = sshll.u32 %s1176_s12, 3 }
   0xe   : > { %s208_s6 = scalar_lea.vmem %s1170_s3, %s820_s30 }
   0xf   : > { %497 = vmatprep.mubr.f32.mxu0 %v424_v2  ;;  %568 = vmatprep.mubr.f32.mxu1 %v425_v3  ;;  %s936_s23 = scalar_lea.vmem %s1167_s0, %s821_s20 }
  0x10   : > { %v245_v4 = vld [vmem:[%s936_s23 + $0xf8] sm:$0xff]  ;;  %v244_v5 = vld [vmem:[%s936_s23 + $0xf0] sm:$0xff]  ;;  %v243_v6 = vld [vmem:[%s936_s23 + $0xe8] sm:$0xff] }
  0x11   : > { %433 = vmatprep.subr.mxu0 %v245_v4  ;;  %v309_v7 = vld [vmem:[%s936_s23 + $0x2f8] sm:$0xff]  ;;  %v242_v8 = vld [vmem:[%s936_s23 + $0xe0] sm:$0xff]  ;;  %v308_v9 = vld [vmem:[%s936_s23 + $0x2f0] sm:$0xff] }
  0x12   : > { %434 = vmatpush1.msra.mxu0 %v244_v5  ;;  %504 = vmatprep.subr.mxu1 %v309_v7  ;;  %v241_v10 = vld [vmem:[%s936_s23 + $0xd8] sm:$0xff]  ;;  %v307_v11 = vld [vmem:[%s936_s23 + $0x2e8] sm:$0xff]  ;;  %v240_v12 = vld [vmem:[%s936_s23 + $0xd0] sm:$0xff] }
  0x13   : > { %435 = vmatprep.subr.mxu0 %v243_v6  ;;  %505 = vmatpush1.msra.mxu1 %v308_v9  ;;  %v306_v13 = vld [vmem:[%s936_s23 + $0x2e0] sm:$0xff]  ;;  %v305_v14 = vld [vmem:[%s936_s23 + $0x2d8] sm:$0xff]  ;;  %v239_v15 = vld [vmem:[%s936_s23 + $0xc8] sm:$0xff] }
  0x14   : > { %436 = vmatpush1.msra.mxu0 %v242_v8  ;;  %506 = vmatprep.subr.mxu1 %v307_v11  ;;  %v304_v16 = vld [vmem:[%s936_s23 + $0x2d0] sm:$0xff]  ;;  %v238_v17 = vld [vmem:[%s936_s23 + $0xc0] sm:$0xff]  ;;  %v303_v18 = vld [vmem:[%s936_s23 + $0x2c8] sm:$0xff] }
  0x15   : > { %437 = vmatprep.subr.mxu0 %v241_v10  ;;  %507 = vmatpush1.msra.mxu1 %v306_v13  ;;  %v237_v19 = vld [vmem:[%s936_s23 + $0xb8] sm:$0xff]  ;;  %v302_v20 = vld [vmem:[%s936_s23 + $0x2c0] sm:$0xff]  ;;  %v236_v21 = vld [vmem:[%s936_s23 + $0xb0] sm:$0xff] }
  0x16   : > { %438 = vmatpush1.msra.mxu0 %v240_v12  ;;  %508 = vmatprep.subr.mxu1 %v305_v14  ;;  %v301_v22 = vld [vmem:[%s936_s23 + $0x2b8] sm:$0xff]  ;;  %v235_v23 = vld [vmem:[%s936_s23 + $0xa8] sm:$0xff]  ;;  %v300_v24 = vld [vmem:[%s936_s23 + $0x2b0] sm:$0xff] }
  0x17   : > { %439 = vmatprep.subr.mxu0 %v239_v15  ;;  %509 = vmatpush1.msra.mxu1 %v304_v16  ;;  %v234_v25 = vld [vmem:[%s936_s23 + $0xa0] sm:$0xff]  ;;  %v299_v26 = vld [vmem:[%s936_s23 + $0x2a8] sm:$0xff]  ;;  %v233_v27 = vld [vmem:[%s936_s23 + $0x98] sm:$0xff] }
  0x18   : > { %440 = vmatpush1.msra.mxu0 %v238_v17  ;;  %510 = vmatprep.subr.mxu1 %v303_v18  ;;  %v298_v28 = vld [vmem:[%s936_s23 + $0x2a0] sm:$0xff]  ;;  %v232_v29 = vld [vmem:[%s936_s23 + $0x90] sm:$0xff]  ;;  %v297_v30 = vld [vmem:[%s936_s23 + $0x298] sm:$0xff] }
  0x19   : > { %441 = vmatprep.subr.mxu0 %v237_v19  ;;  %511 = vmatpush1.msra.mxu1 %v302_v20  ;;  %v231_v31 = vld [vmem:[%s936_s23 + $0x88] sm:$0xff]  ;;  %v296_v32 = vld [vmem:[%s936_s23 + $0x290] sm:$0xff]  ;;  %v230_v33 = vld [vmem:[%s936_s23 + $0x80] sm:$0xff] }
  0x1a   : > { %442 = vmatpush1.msra.mxu0 %v236_v21  ;;  %512 = vmatprep.subr.mxu1 %v301_v22  ;;  %v295_v34 = vld [vmem:[%s936_s23 + $0x288] sm:$0xff]  ;;  %v229_v35 = vld [vmem:[%s936_s23 + $0x78] sm:$0xff]  ;;  %v294_v36 = vld [vmem:[%s936_s23 + $0x280] sm:$0xff] }
  0x1b   : > { %443 = vmatprep.subr.mxu0 %v235_v23  ;;  %513 = vmatpush1.msra.mxu1 %v300_v24  ;;  %v228_v37 = vld [vmem:[%s936_s23 + $0x70] sm:$0xff]  ;;  %v293_v38 = vld [vmem:[%s936_s23 + $0x278] sm:$0xff]  ;;  %v227_v39 = vld [vmem:[%s936_s23 + $0x68] sm:$0xff] }
  0x1c   : > { %444 = vmatpush1.msra.mxu0 %v234_v25  ;;  %514 = vmatprep.subr.mxu1 %v299_v26  ;;  %v292_v40 = vld [vmem:[%s936_s23 + $0x270] sm:$0xff]  ;;  %v226_v41 = vld [vmem:[%s936_s23 + $0x60] sm:$0xff]  ;;  %v291_v42 = vld [vmem:[%s936_s23 + $0x268] sm:$0xff] }
  0x1d   : > { %445 = vmatprep.subr.mxu0 %v233_v27  ;;  %515 = vmatpush1.msra.mxu1 %v298_v28  ;;  %v225_v43 = vld [vmem:[%s936_s23 + $0x58] sm:$0xff]  ;;  %v290_v44 = vld [vmem:[%s936_s23 + $0x260] sm:$0xff]  ;;  %v224_v45 = vld [vmem:[%s936_s23 + $0x50] sm:$0xff] }
  0x1e   : > { %446 = vmatpush1.msra.mxu0 %v232_v29  ;;  %516 = vmatprep.subr.mxu1 %v297_v30  ;;  %v289_v46 = vld [vmem:[%s936_s23 + $0x258] sm:$0xff]  ;;  %v223_v47 = vld [vmem:[%s936_s23 + $0x48] sm:$0xff]  ;;  %v288_v48 = vld [vmem:[%s936_s23 + $0x250] sm:$0xff] }
  0x1f   : > { %447 = vmatprep.subr.mxu0 %v231_v31  ;;  %517 = vmatpush1.msra.mxu1 %v296_v32  ;;  %v222_v49 = vld [vmem:[%s936_s23 + $0x40] sm:$0xff]  ;;  %v287_v50 = vld [vmem:[%s936_s23 + $0x248] sm:$0xff]  ;;  %v221_v51 = vld [vmem:[%s936_s23 + $0x38] sm:$0xff] }
  0x20   : > { %448 = vmatpush1.msra.mxu0 %v230_v33  ;;  %518 = vmatprep.subr.mxu1 %v295_v34  ;;  %v286_v52 = vld [vmem:[%s936_s23 + $0x240] sm:$0xff]  ;;  %v220_v53 = vld [vmem:[%s936_s23 + $0x30] sm:$0xff]  ;;  %v285_v54 = vld [vmem:[%s936_s23 + $0x238] sm:$0xff] }
  0x21   : > { %449 = vmatprep.subr.mxu0 %v229_v35  ;;  %519 = vmatpush1.msra.mxu1 %v294_v36  ;;  %v219_v55 = vld [vmem:[%s936_s23 + $0x28] sm:$0xff]  ;;  %v284_v56 = vld [vmem:[%s936_s23 + $0x230] sm:$0xff]  ;;  %v218_v57 = vld [vmem:[%s936_s23 + $0x20] sm:$0xff] }
  0x22   : > { %450 = vmatpush1.msra.mxu0 %v228_v37  ;;  %520 = vmatprep.subr.mxu1 %v293_v38  ;;  %v283_v58 = vld [vmem:[%s936_s23 + $0x228] sm:$0xff]  ;;  %v217_v59 = vld [vmem:[%s936_s23 + $0x18] sm:$0xff]  ;;  %v282_v60 = vld [vmem:[%s936_s23 + $0x220] sm:$0xff] }
  0x23   : > { %451 = vmatprep.subr.mxu0 %v227_v39  ;;  %521 = vmatpush1.msra.mxu1 %v292_v40  ;;  %v216_v61 = vld [vmem:[%s936_s23 + $0x10] sm:$0xff]  ;;  %v281_v62 = vld [vmem:[%s936_s23 + $0x218] sm:$0xff]  ;;  %v215_v63 = vld [vmem:[%s936_s23 + $0x8] sm:$0xff] }
  0x24   : > { %452 = vmatpush1.msra.mxu0 %v226_v41  ;;  %522 = vmatprep.subr.mxu1 %v291_v42  ;;  %v280_v2 = vld [vmem:[%s936_s23 + $0x210] sm:$0xff]  ;;  %v214_v3 = vld [vmem:[%s936_s23] sm:$0xff]  ;;  %v279_v4 = vld [vmem:[%s936_s23 + $0x208] sm:$0xff] }
  0x25   : > { %453 = vmatprep.subr.mxu0 %v225_v43  ;;  %523 = vmatpush1.msra.mxu1 %v290_v44  ;;  %v277_v5 = vld [vmem:[%s936_s23 + $0x1f8] sm:$0xff]  ;;  %v278_v6 = vld [vmem:[%s936_s23 + $0x200] sm:$0xff]  ;;  %v276_v7 = vld [vmem:[%s936_s23 + $0x1f0] sm:$0xff] }
  0x26   : > { %454 = vmatpush1.msra.mxu0 %v224_v45  ;;  %524 = vmatprep.subr.mxu1 %v289_v46  ;;  %v341_v8 = vld [vmem:[%s936_s23 + $0x3f8] sm:$0xff]  ;;  %v275_v9 = vld [vmem:[%s936_s23 + $0x1e8] sm:$0xff]  ;;  %v340_v10 = vld [vmem:[%s936_s23 + $0x3f0] sm:$0xff] }
  0x27   : > { %455 = vmatprep.subr.mxu0 %v223_v47  ;;  %525 = vmatpush1.msra.mxu1 %v288_v48  ;;  %v274_v11 = vld [vmem:[%s936_s23 + $0x1e0] sm:$0xff]  ;;  %v339_v12 = vld [vmem:[%s936_s23 + $0x3e8] sm:$0xff]  ;;  %v273_v13 = vld [vmem:[%s936_s23 + $0x1d8] sm:$0xff] }
  0x28   : > { %456 = vmatpush1.msra.mxu0 %v222_v49  ;;  %526 = vmatprep.subr.mxu1 %v287_v50  ;;  %v338_v14 = vld [vmem:[%s936_s23 + $0x3e0] sm:$0xff]  ;;  %v272_v15 = vld [vmem:[%s936_s23 + $0x1d0] sm:$0xff]  ;;  %v337_v16 = vld [vmem:[%s936_s23 + $0x3d8] sm:$0xff] }
  0x29   : > { %457 = vmatprep.subr.mxu0 %v221_v51  ;;  %527 = vmatpush1.msra.mxu1 %v286_v52  ;;  %v271_v17 = vld [vmem:[%s936_s23 + $0x1c8] sm:$0xff]  ;;  %v336_v18 = vld [vmem:[%s936_s23 + $0x3d0] sm:$0xff]  ;;  %v270_v19 = vld [vmem:[%s936_s23 + $0x1c0] sm:$0xff] }
  0x2a   : > { %458 = vmatpush1.msra.mxu0 %v220_v53  ;;  %528 = vmatprep.subr.mxu1 %v285_v54  ;;  %v335_v20 = vld [vmem:[%s936_s23 + $0x3c8] sm:$0xff]  ;;  %v269_v21 = vld [vmem:[%s936_s23 + $0x1b8] sm:$0xff]  ;;  %v334_v22 = vld [vmem:[%s936_s23 + $0x3c0] sm:$0xff] }
  0x2b   : > { %459 = vmatprep.subr.mxu0 %v219_v55  ;;  %529 = vmatpush1.msra.mxu1 %v284_v56  ;;  %v268_v23 = vld [vmem:[%s936_s23 + $0x1b0] sm:$0xff]  ;;  %v333_v24 = vld [vmem:[%s936_s23 + $0x3b8] sm:$0xff]  ;;  %v267_v25 = vld [vmem:[%s936_s23 + $0x1a8] sm:$0xff] }
  0x2c   : > { %460 = vmatpush1.msra.mxu0 %v218_v57  ;;  %530 = vmatprep.subr.mxu1 %v283_v58  ;;  %v332_v26 = vld [vmem:[%s936_s23 + $0x3b0] sm:$0xff]  ;;  %v266_v27 = vld [vmem:[%s936_s23 + $0x1a0] sm:$0xff]  ;;  %v331_v28 = vld [vmem:[%s936_s23 + $0x3a8] sm:$0xff] }
  0x2d   : > { %461 = vmatprep.subr.mxu0 %v217_v59  ;;  %531 = vmatpush1.msra.mxu1 %v282_v60  ;;  %v265_v29 = vld [vmem:[%s936_s23 + $0x198] sm:$0xff]  ;;  %v330_v30 = vld [vmem:[%s936_s23 + $0x3a0] sm:$0xff]  ;;  %v264_v31 = vld [vmem:[%s936_s23 + $0x190] sm:$0xff] }
  0x2e   : > { %462 = vmatpush1.msra.mxu0 %v216_v61  ;;  %532 = vmatprep.subr.mxu1 %v281_v62  ;;  %v329_v32 = vld [vmem:[%s936_s23 + $0x398] sm:$0xff]  ;;  %v263_v33 = vld [vmem:[%s936_s23 + $0x188] sm:$0xff]  ;;  %v328_v34 = vld [vmem:[%s936_s23 + $0x390] sm:$0xff] }
  0x2f   : > { %463 = vmatprep.subr.mxu0 %v215_v63  ;;  %533 = vmatpush1.msra.mxu1 %v280_v2  ;;  %v262_v35 = vld [vmem:[%s936_s23 + $0x180] sm:$0xff]  ;;  %v327_v36 = vld [vmem:[%s936_s23 + $0x388] sm:$0xff]  ;;  %v261_v37 = vld [vmem:[%s936_s23 + $0x178] sm:$0xff] }
  0x30   : > { %464 = vmatpush1.msra.mxu0 %v214_v3  ;;  %534 = vmatprep.subr.mxu1 %v279_v4  ;;  %v326_v38 = vld [vmem:[%s936_s23 + $0x380] sm:$0xff]  ;;  %v260_v39 = vld [vmem:[%s936_s23 + $0x170] sm:$0xff]  ;;  %v325_v40 = vld [vmem:[%s936_s23 + $0x378] sm:$0xff] }
  0x31   : > { %465 = vmatprep.subr.mxu0 %v277_v5  ;;  %535 = vmatpush1.msra.mxu1 %v278_v6  ;;  %v259_v41 = vld [vmem:[%s936_s23 + $0x168] sm:$0xff]  ;;  %v324_v42 = vld [vmem:[%s936_s23 + $0x370] sm:$0xff]  ;;  %v258_v43 = vld [vmem:[%s936_s23 + $0x160] sm:$0xff] }
  0x32   : > { %466 = vmatpush2.msra.mxu0 %v276_v7  ;;  %536 = vmatprep.subr.mxu1 %v341_v8  ;;  %v323_v44 = vld [vmem:[%s936_s23 + $0x368] sm:$0xff]  ;;  %v257_v45 = vld [vmem:[%s936_s23 + $0x158] sm:$0xff]  ;;  %v322_v46 = vld [vmem:[%s936_s23 + $0x360] sm:$0xff] }
  0x33   : > { %467 = vmatprep.subr.mxu0 %v275_v9  ;;  %537 = vmatpush2.msra.mxu1 %v340_v10  ;;  %v256_v47 = vld [vmem:[%s936_s23 + $0x150] sm:$0xff]  ;;  %v321_v48 = vld [vmem:[%s936_s23 + $0x358] sm:$0xff]  ;;  %v255_v49 = vld [vmem:[%s936_s23 + $0x148] sm:$0xff] }
  0x34   : > { %468 = vmatpush2.msra.mxu0 %v274_v11  ;;  %538 = vmatprep.subr.mxu1 %v339_v12  ;;  %v320_v50 = vld [vmem:[%s936_s23 + $0x350] sm:$0xff]  ;;  %v254_v51 = vld [vmem:[%s936_s23 + $0x140] sm:$0xff]  ;;  %v319_v52 = vld [vmem:[%s936_s23 + $0x348] sm:$0xff] }
  0x35   : > { %469 = vmatprep.subr.mxu0 %v273_v13  ;;  %539 = vmatpush2.msra.mxu1 %v338_v14  ;;  %v253_v53 = vld [vmem:[%s936_s23 + $0x138] sm:$0xff]  ;;  %v318_v54 = vld [vmem:[%s936_s23 + $0x340] sm:$0xff]  ;;  %v252_v55 = vld [vmem:[%s936_s23 + $0x130] sm:$0xff] }
  0x36   : > { %470 = vmatpush2.msra.mxu0 %v272_v15  ;;  %540 = vmatprep.subr.mxu1 %v337_v16  ;;  %v317_v56 = vld [vmem:[%s936_s23 + $0x338] sm:$0xff]  ;;  %v251_v57 = vld [vmem:[%s936_s23 + $0x128] sm:$0xff]  ;;  %v316_v58 = vld [vmem:[%s936_s23 + $0x330] sm:$0xff] }
  0x37   : > { %471 = vmatprep.subr.mxu0 %v271_v17  ;;  %541 = vmatpush2.msra.mxu1 %v336_v18  ;;  %v250_v59 = vld [vmem:[%s936_s23 + $0x120] sm:$0xff]  ;;  %v315_v60 = vld [vmem:[%s936_s23 + $0x328] sm:$0xff]  ;;  %v249_v61 = vld [vmem:[%s936_s23 + $0x118] sm:$0xff] }
  0x38   : > { %472 = vmatpush2.msra.mxu0 %v270_v19  ;;  %542 = vmatprep.subr.mxu1 %v335_v20  ;;  %v314_v62 = vld [vmem:[%s936_s23 + $0x320] sm:$0xff]  ;;  %v248_v63 = vld [vmem:[%s936_s23 + $0x110] sm:$0xff]  ;;  %v313_v2 = vld [vmem:[%s936_s23 + $0x318] sm:$0xff] }
  0x39   : > { %473 = vmatprep.subr.mxu0 %v269_v21  ;;  %543 = vmatpush2.msra.mxu1 %v334_v22  ;;  %v247_v3 = vld [vmem:[%s936_s23 + $0x108] sm:$0xff]  ;;  %v312_v4 = vld [vmem:[%s936_s23 + $0x310] sm:$0xff]  ;;  %v246_v5 = vld [vmem:[%s936_s23 + $0x100] sm:$0xff] }
  0x3a   : > { %474 = vmatpush2.msra.mxu0 %v268_v23  ;;  %544 = vmatprep.subr.mxu1 %v333_v24  ;;  %v311_v6 = vld [vmem:[%s936_s23 + $0x308] sm:$0xff]  ;;  %v373_v7 = vld [vmem:[%s936_s23 + $0x4f8] sm:$0xff]  ;;  %v310_v8 = vld [vmem:[%s936_s23 + $0x300] sm:$0xff] }
  0x3b   : > { %475 = vmatprep.subr.mxu0 %v267_v25  ;;  %545 = vmatpush2.msra.mxu1 %v332_v26  ;;  %v372_v9 = vld [vmem:[%s936_s23 + $0x4f0] sm:$0xff]  ;;  %v371_v10 = vld [vmem:[%s936_s23 + $0x4e8] sm:$0xff]  ;;  %v370_v11 = vld [vmem:[%s936_s23 + $0x4e0] sm:$0xff] }
  0x3c   : > { %476 = vmatpush2.msra.mxu0 %v266_v27  ;;  %546 = vmatprep.subr.mxu1 %v331_v28  ;;  %v413_v12 = vld [vmem:[%s936_s23 + $0x638] sm:$0xff]  ;;  %v412_v14 = vld [vmem:[%s936_s23 + $0x630] sm:$0xff]  ;;  %v411_v16 = vld [vmem:[%s936_s23 + $0x628] sm:$0xff] }
  0x3d   : > { %477 = vmatprep.subr.mxu0 %v265_v29  ;;  %547 = vmatpush2.msra.mxu1 %v330_v30  ;;  %v369_v13 = vld [vmem:[%s936_s23 + $0x4d8] sm:$0xff]  ;;  %v368_v15 = vld [vmem:[%s936_s23 + $0x4d0] sm:$0xff]  ;;  %v410_v17 = vld [vmem:[%s936_s23 + $0x620] sm:$0xff] }
  0x3e   : > { %478 = vmatpush2.msra.mxu0 %v264_v31  ;;  %548 = vmatprep.subr.mxu1 %v329_v32  ;;  %v1082_v18 = vld [vmem:[%s1168_s1 + $0x10] sm:$0x77]  ;;  %v366_v19 = vld [vmem:[%s936_s23 + $0x4c0] sm:$0xff]  ;;  %v365_v20 = vld [vmem:[%s936_s23 + $0x4b8] sm:$0xff] }
  0x3f   : > { %479 = vmatprep.subr.mxu0 %v263_v33  ;;  %549 = vmatpush2.msra.mxu1 %v328_v34  ;;  %v408_v21 = vld [vmem:[%s936_s23 + $0x610] sm:$0xff]  ;;  %v407_v23 = vld [vmem:[%s936_s23 + $0x608] sm:$0xff]  ;;  %v426_v24 = vcombine.high %v1082_v18, %v1082_v18  ;;  %v362_v26 = vld [vmem:[%s936_s23 + $0x4a0] sm:$0xff]  ;;  %v876_v33 = vmov 0.0  }
  0x40   : > { %480 = vmatpush2.msra.mxu0 %v262_v35  ;;  %550 = vmatprep.subr.mxu1 %v327_v36  ;;  %v364_v22 = vld [vmem:[%s936_s23 + $0x4b0] sm:$0xff]  ;;  %v363_v25 = vld [vmem:[%s936_s23 + $0x4a8] sm:$0xff]  ;;  %v406_v27 = vld [vmem:[%s936_s23 + $0x600] sm:$0xff] }
  0x41   : > { %481 = vmatprep.subr.mxu0 %v261_v37  ;;  %551 = vmatpush2.msra.mxu1 %v326_v38  ;;  %v361_v28 = vld [vmem:[%s936_s23 + $0x498] sm:$0xff]  ;;  %v360_v29 = vld [vmem:[%s936_s23 + $0x490] sm:$0xff]  ;;  %v359_v31 = vld [vmem:[%s936_s23 + $0x488] sm:$0xff]  ;;  %v877_v37 = vmov 0  }
  0x42   : > { %482 = vmatpush2.msra.mxu0 %v260_v39  ;;  %552 = vmatprep.subr.mxu1 %v325_v40  ;;  %v213_v30 = vld [vmem:[%s1168_s1 + $0x18] sm:$0x7]  ;;  %v358_v32 = vld [vmem:[%s936_s23 + $0x480] sm:$0xff]  ;;  %v356_v36 = vld [vmem:[%s936_s23 + $0x470] sm:$0xff] }
  0x43   : > { %483 = vmatprep.subr.mxu0 %v259_v41  ;;  %553 = vmatpush2.msra.mxu1 %v324_v42  ;;  %v414_v34 = vld [vmem:[%s1169_s2] sm:$0x7]  ;;  %v357_v35 = vld [vmem:[%s936_s23 + $0x478] sm:$0xff]  ;;  %v355_v38 = vld [vmem:[%s936_s23 + $0x468] sm:$0xff] }
  0x44   : > { %484 = vmatpush2.msra.mxu0 %v258_v43  ;;  %554 = vmatprep.subr.mxu1 %v323_v44  ;;  %v354_v39 = vld [vmem:[%s936_s23 + $0x460] sm:$0xff]  ;;  %v353_v40 = vld [vmem:[%s936_s23 + $0x458] sm:$0xff]  ;;  %v352_v41 = vld [vmem:[%s936_s23 + $0x450] sm:$0xff] }
  0x45   : > { %485 = vmatprep.subr.mxu0 %v257_v45  ;;  %555 = vmatpush2.msra.mxu1 %v322_v46  ;;  %v351_v42 = vld [vmem:[%s936_s23 + $0x448] sm:$0xff]  ;;  %v350_v43 = vld [vmem:[%s936_s23 + $0x440] sm:$0xff]  ;;  %v349_v44 = vld [vmem:[%s936_s23 + $0x438] sm:$0xff] }
  0x46   : > { %486 = vmatpush2.msra.mxu0 %v256_v47  ;;  %556 = vmatprep.subr.mxu1 %v321_v48  ;;  %v348_v45 = vld [vmem:[%s936_s23 + $0x430] sm:$0xff]  ;;  %v347_v46 = vld [vmem:[%s936_s23 + $0x428] sm:$0xff]  ;;  %v346_v47 = vld [vmem:[%s936_s23 + $0x420] sm:$0xff] }
  0x47   : > { %487 = vmatprep.subr.mxu0 %v255_v49  ;;  %557 = vmatpush2.msra.mxu1 %v320_v50  ;;  %v345_v48 = vld [vmem:[%s936_s23 + $0x418] sm:$0xff]  ;;  %v344_v49 = vld [vmem:[%s936_s23 + $0x410] sm:$0xff]  ;;  %v343_v50 = vld [vmem:[%s936_s23 + $0x408] sm:$0xff] }
  0x48   : > { %488 = vmatpush2.msra.mxu0 %v254_v51  ;;  %558 = vmatprep.subr.mxu1 %v319_v52  ;;  %v342_v51 = vld [vmem:[%s936_s23 + $0x400] sm:$0xff]  ;;  %v405_v52 = vld [vmem:[%s936_s23 + $0x5f8] sm:$0xff] }
  0x49   : > { %489 = vmatprep.subr.mxu0 %v253_v53  ;;  %559 = vmatpush2.msra.mxu1 %v318_v54  ;;  %v404_v53 = vld [vmem:[%s936_s23 + $0x5f0] sm:$0xff]  ;;  %v403_v54 = vld [vmem:[%s936_s23 + $0x5e8] sm:$0xff] }
  0x4a   : > { %490 = vmatpush2.msra.mxu0 %v252_v55  ;;  %560 = vmatprep.subr.mxu1 %v317_v56  ;;  %v402_v55 = vld [vmem:[%s936_s23 + $0x5e0] sm:$0xff]  ;;  %v401_v56 = vld [vmem:[%s936_s23 + $0x5d8] sm:$0xff] }
  0x4b   : > { %491 = vmatprep.subr.mxu0 %v251_v57  ;;  %561 = vmatpush2.msra.mxu1 %v316_v58  ;;  %v400_v57 = vld [vmem:[%s936_s23 + $0x5d0] sm:$0xff]  ;;  %v399_v58 = vld [vmem:[%s936_s23 + $0x5c8] sm:$0xff] }
  0x4c   : > { %492 = vmatpush2.msra.mxu0 %v250_v59  ;;  %562 = vmatprep.subr.mxu1 %v315_v60  ;;  %v398_v59 = vld [vmem:[%s936_s23 + $0x5c0] sm:$0xff]  ;;  %v397_v60 = vld [vmem:[%s936_s23 + $0x5b8] sm:$0xff] }
  0x4d   : > { %493 = vmatprep.subr.mxu0 %v249_v61  ;;  %563 = vmatpush2.msra.mxu1 %v314_v62  ;;  %v396_v61 = vld [vmem:[%s936_s23 + $0x5b0] sm:$0xff]  ;;  %v395_v62 = vld [vmem:[%s936_s23 + $0x5a8] sm:$0xff] }
  0x4e   : > { %494 = vmatpush2.msra.mxu0 %v248_v63  ;;  %564 = vmatprep.subr.mxu1 %v313_v2  ;;  %v394_v63 = vld [vmem:[%s936_s23 + $0x5a0] sm:$0xff]  ;;  %v393_v2 = vld [vmem:[%s936_s23 + $0x598] sm:$0xff] }
  0x4f   : > { %495 = vmatprep.subr.mxu0 %v247_v3  ;;  %565 = vmatpush2.msra.mxu1 %v312_v4  ;;  %v392_v3 = vld [vmem:[%s936_s23 + $0x590] sm:$0xff]  ;;  %v391_v4 = vld [vmem:[%s936_s23 + $0x588] sm:$0xff] }
  0x50   : > { %496 = vmatpush2.msra.mxu0 %v246_v5  ;;  %566 = vmatprep.subr.mxu1 %v311_v6  ;;  %v390_v5 = vld [vmem:[%s936_s23 + $0x580] sm:$0xff]  ;;  %v389_v6 = vld [vmem:[%s936_s23 + $0x578] sm:$0xff] }
  0x51   : > { %498 = vmatmul.mubr.f32.vlgmr.msra.gmra.mxu0 %v919_v0  ;;  %575 = vmatprep.subr.mxu0 %v373_v7  ;;  %v367_v0 = vld [vmem:[%s936_s23 + $0x4c8] sm:$0xff]  ;;  %v388_v7 = vld [vmem:[%s936_s23 + $0x570] sm:$0xff] }
  0x52   : > { %567 = vmatpush2.msra.mxu1 %v310_v8  ;;  %576 = vmatpush1.msra.mxu0 %v372_v9  ;;  %v387_v8 = vld [vmem:[%s936_s23 + $0x568] sm:$0xff]  ;;  %v386_v9 = vld [vmem:[%s936_s23 + $0x560] sm:$0xff] }
  0x53   : > { %569 = vmatmul.mubr.f32.vlgmr.msra.gmra.mxu1 %v924_v1  ;;  %577 = vmatprep.subr.mxu0 %v371_v10  ;;  %v409_v1 = vld [vmem:[%s936_s23 + $0x618] sm:$0xff] }
  0x54   : > { %578 = vmatpush1.msra.mxu0 %v370_v11  ;;  %670 = vmatprep.subr.mxu1 %v413_v12  ;;  %v385_v10 = vld [vmem:[%s936_s23 + $0x558] sm:$0xff]  ;;  %v384_v11 = vld [vmem:[%s936_s23 + $0x550] sm:$0xff]  ;;  %v383_v12 = vld [vmem:[%s936_s23 + $0x548] sm:$0xff] }
  0x55   : > { %579 = vmatprep.subr.mxu0 %v369_v13  ;;  %671 = vmatpush1.msra.mxu1 %v412_v14  ;;  %v382_v13 = vld [vmem:[%s936_s23 + $0x540] sm:$0xff]  ;;  %v381_v14 = vld [vmem:[%s936_s23 + $0x538] sm:$0xff] }
  0x56   : > { %580 = vmatpush1.msra.mxu0 %v368_v15  ;;  %672 = vmatprep.subr.mxu1 %v411_v16  ;;  %v380_v15 = vld [vmem:[%s936_s23 + $0x530] sm:$0xff]  ;;  %v379_v16 = vld [vmem:[%s936_s23 + $0x528] sm:$0xff] }
  0x57   : > { %581 = vmatprep.subr.mxu0 %v367_v0  ;;  %673 = vmatpush1.msra.mxu1 %v410_v17  ;;  %v378_v0 = vld [vmem:[%s936_s23 + $0x520] sm:$0xff]  ;;  %v377_v17 = vld [vmem:[%s936_s23 + $0x518] sm:$0xff] }
  0x58   : > { %582 = vmatpush1.msra.mxu0 %v366_v19  ;;  %674 = vmatprep.subr.mxu1 %v409_v1  ;;  %v376_v19 = vld [vmem:[%s936_s23 + $0x510] sm:$0xff]  ;;  %v375_v1 = vld [vmem:[%s936_s23 + $0x508] sm:$0xff] }
  0x59   : > { %583 = vmatprep.subr.mxu0 %v365_v20  ;;  %675 = vmatpush1.msra.mxu1 %v408_v21  ;;  %v374_v20 = vld [vmem:[%s936_s23 + $0x500] sm:$0xff] }
  0x5a   : > { %584 = vmatpush1.msra.mxu0 %v364_v22  ;;  %676 = vmatprep.subr.mxu1 %v407_v23 }
  0x5b   : > { %585 = vmatprep.subr.mxu0 %v363_v25  ;;  %639 = vmatprep.mubr.f32.mxu0 %v426_v24 }
  0x5c   : > { %586 = vmatpush1.msra.mxu0 %v362_v26  ;;  %677 = vmatpush1.msra.mxu1 %v406_v27 }
  0x5d   : > { %587 = vmatprep.subr.mxu0 %v361_v28  ;;  %710 = vmatprep.mubr.f32.mxu1 %v876_v33 }
  0x5e   : > { %588 = vmatpush1.msra.mxu0 %v360_v29  ;;  %817 = vmatmul.mubr.msk.f32.vlgmr.msra.gmra.mxu1 %vm430_vm0, %v213_v30 }
  0x5f   : > { %589 = vmatprep.subr.mxu0 %v359_v31  ;;  %848 = vset.pattern.permute.xlu0 %v877_v37 }
  0x60   : > { %590 = vmatpush1.msra.mxu0 %v358_v32  ;;  %417 = vperm.xlu0 %848, %v414_v34  }
  0x61   : > { %591 = vmatprep.subr.mxu0 %v357_v35 }
  0x62   : > { %592 = vmatpush1.msra.mxu0 %v356_v36 }
  0x63   : > { %593 = vmatprep.subr.mxu0 %v355_v38 }
  0x64   : > { %594 = vmatpush1.msra.mxu0 %v354_v39 }
  0x65   : > { %595 = vmatprep.subr.mxu0 %v353_v40 }
  0x66   : > { %596 = vmatpush1.msra.mxu0 %v352_v41 }
  0x67   : > { %597 = vmatprep.subr.mxu0 %v351_v42 }
  0x68   : > { %598 = vmatpush1.msra.mxu0 %v350_v43 }
  0x69   : > { %599 = vmatprep.subr.mxu0 %v349_v44 }
  0x6a   : > { %600 = vmatpush1.msra.mxu0 %v348_v45 }
  0x6b   : > { %601 = vmatprep.subr.mxu0 %v347_v46 }
  0x6c   : > { %602 = vmatpush1.msra.mxu0 %v346_v47 }
  0x6d   : > { %603 = vmatprep.subr.mxu0 %v345_v48 }
  0x6e   : > { %604 = vmatpush1.msra.mxu0 %v344_v49 }
  0x6f   : > { %605 = vmatprep.subr.mxu0 %v343_v50 }
  0x70   : > { %606 = vmatpush1.msra.mxu0 %v342_v51 }
  0x71   : > { %607 = vmatprep.subr.mxu0 %v405_v52 }
  0x72   : > { %608 = vmatpush2.msra.mxu0 %v404_v53 }
  0x73   : > { %609 = vmatprep.subr.mxu0 %v403_v54 }
  0x74   : > { %610 = vmatpush2.msra.mxu0 %v402_v55 }
  0x75   : > { %611 = vmatprep.subr.mxu0 %v401_v56 }
  0x76   : > { %612 = vmatpush2.msra.mxu0 %v400_v57 }
  0x77   : > { %613 = vmatprep.subr.mxu0 %v399_v58 }
  0x78   : > { %614 = vmatpush2.msra.mxu0 %v398_v59 }
  0x79   : > { %615 = vmatprep.subr.mxu0 %v397_v60 }
  0x7a   : > { %616 = vmatpush2.msra.mxu0 %v396_v61 }
  0x7b   : > { %617 = vmatprep.subr.mxu0 %v395_v62 }
  0x7c   : > { %618 = vmatpush2.msra.mxu0 %v394_v63 }
  0x7d   : > { %619 = vmatprep.subr.mxu0 %v393_v2 }
  0x7e   : > { %620 = vmatpush2.msra.mxu0 %v392_v3 }
  0x7f   : > { %621 = vmatprep.subr.mxu0 %v391_v4 }
  0x80   : > { %622 = vmatpush2.msra.mxu0 %v390_v5 }
  0x81   : > { %623 = vmatprep.subr.mxu0 %v389_v6 }
  0x82   : > { %624 = vmatpush2.msra.mxu0 %v388_v7 }
  0x83   : > { %625 = vmatprep.subr.mxu0 %v387_v8 }
  0x84   : > { %626 = vmatpush2.msra.mxu0 %v386_v9 }
  0x85   : > { %627 = vmatprep.subr.mxu0 %v385_v10 }
  0x86   : > { %628 = vmatpush2.msra.mxu0 %v384_v11 }
  0x87   : > { %629 = vmatprep.subr.mxu0 %v383_v12 }
  0x88   : > { %630 = vmatpush2.msra.mxu0 %v382_v13 }
  0x89   : > { %631 = vmatprep.subr.mxu0 %v381_v14 }
  0x8a   : > { %632 = vmatpush2.msra.mxu0 %v380_v15 }
  0x8b   : > { %633 = vmatprep.subr.mxu0 %v379_v16 }
  0x8c   : > { %634 = vmatpush2.msra.mxu0 %v378_v0 }
  0x8d   : > { %635 = vmatprep.subr.mxu0 %v377_v17 }
  0x8e   : > { %636 = vmatpush2.msra.mxu0 %v376_v19 }
  0x8f   : > { %637 = vmatprep.subr.mxu0 %v375_v1 }
  0x90   : > { %638 = vmatpush2.msra.mxu0 %v374_v20 }
  0x91   : > { %640 = vmatmul.mubr.f32.vlgmr.msra.gmra.mxu0 %v1082_v18 }
  0xdb   : > { %v418_v22 = vpop.permute.xlu0 %417 }
 0x111   : > { %v499_v21 = vpop.f32.mrf.mxu0 }
 0x112   : > { %v500_v25 = vadd.f32 %v499_v21, %v418_v22 }
 0x113   : > { %v501_v23 = vpop.f32.mrf.mxu0  ;;  %v570_v24 = vpop.f32.mrf.mxu1 }
 0x114   : > { %v502_v26 = vadd.f32 %v501_v23, %v418_v22  ;;  %v571_v28 = vadd.f32 %v570_v24, %v500_v25 }
 0x115   : > { %v572_v27 = vpop.f32.mrf.mxu1 }
 0x116   : > { %v573_v31 = vadd.f32 %v572_v27, %v502_v26 }
 0x11e   : > { %v712_v30 = vpop.f32.mrf.mxu1 }
 0x120   : > { %v714_v35 = vpop.f32.mrf.mxu1 }
 0x151   : > { %v641_v29 = vpop.f32.mrf.mxu0 }
 0x152   : > { %v642_v32 = vadd.f32 %v641_v29, %v571_v28 }
 0x153   : > { %v643_v33 = vpop.f32.mrf.mxu0 }
 0x154   : > { %v644_v34 = vadd.f32 %v643_v33, %v573_v31  ;;  %v713_v36 = vadd.f32 %v712_v30, %v642_v32 }
 0x156   : > { %v715_v37 = vadd.f32 %v714_v35, %v644_v34 }
 0x158   : > { %v719_v18 = vcombine.low %v713_v36, %v715_v37 }
 0x15a   : > { %721 = vst [vmem:[%s208_s6] sm:$0x77] %v719_v18 }
 0x15b PF: > { %s13_s14 = sadd.s32 1, %s874_s14   ;;  %s1171_s12 = smov %s870_s13 }
 0x15c   : > { %p10_p5 = scmp.ge.s32.totalorder %s13_s14, 4   ;;  %s1172_s13 = smov %s1174_s15 }
 0x15e   :  { %12 = sbr.rel (!%p10_p5) target bundleno = 2 (0x2), region = 62 }

</bundles_post_ra>
